<compile_context>
chip_gen: v5e
topology: v5e:2x2
jax: 0.10.0
libtpu: 0.0.40
codegen_flags: <defaults>
</compile_context>

<pallas_src>
import functools

import numpy as np
import jax
import jax.numpy as jnp
from jax import lax
from jax.experimental import pallas as pl
from jax.experimental.pallas import tpu as pltpu


# ----------------------------------------------------------------------------
# Small helpers: padding-aware block sizing + compile-time pooling constants.
# ----------------------------------------------------------------------------
def _padded_bytes(shape, itemsize=4):
    """Bytes of one tile after (8,128) padding of the last two dims."""
    r = shape[-2] if len(shape) >= 2 else 1
    c = shape[-1]
    lead = int(np.prod(shape[:-2])) if len(shape) > 2 else 1
    return lead * (-(-r // 8) * 8) * (-(-c // 128) * 128) * itemsize


def _pick_batch_block(n, per_item_bytes, budget_bytes=4 << 20):
    """Largest divisor of n under the VMEM budget; keep >=2 grid steps (v7x 2 TCs)."""
    cap = max(1, budget_bytes // max(per_item_bytes, 1))
    if n > 1:
        cap = min(cap, (n + 1) // 2)
    b = int(max(1, min(n, cap)))
    while n % b:
        b -= 1
    return b


def _pool_consts(H, W, stride, mode):
    """Compile-time constants for the 3x3/pad=1 pool on the flat H*W layout."""
    HW = H * W
    H_out = (H - 1) // stride + 1
    W_out = (W - 1) // stride + 1
    Q = H_out * W_out
    p = np.arange(HW)
    w = p % W
    h = p // W
    # Per-destination-position tap validity (left / right / up / down neighbor).
    masks = np.stack([(w >= 1), (w <= W - 2), (h >= 1), (h <= H - 2)]).astype(np.float32)

    sel = None
    if stride != 1:
        sel = np.zeros((HW, Q), np.float32)
        for ho in range(H_out):
            for wo in range(W_out):
                sel[ho * stride * W + wo * stride, ho * W_out + wo] = 1.0

    inv = None
    if mode == "avg":
        cnt = np.empty((H_out, W_out), np.float32)
        for ho in range(H_out):
            for wo in range(W_out):
                hc = min(ho * stride + 1, H - 1) - max(ho * stride - 1, 0) + 1
                wc = min(wo * stride + 1, W - 1) - max(wo * stride - 1, 0) + 1
                cnt[ho, wo] = hc * wc
        inv = (1.0 / cnt).reshape(1, Q).astype(np.float32)
    return masks, sel, inv, H_out, W_out, Q


_COMPILER_PARAMS = pltpu.CompilerParams(
    dimension_semantics=("parallel",), vmem_limit_bytes=48 * 1024 * 1024)


# ----------------------------------------------------------------------------
# Shared in-kernel pooling helpers (values in, values out).
# ----------------------------------------------------------------------------
def _pool_window_flat(v, masks_ref, mode, W, HW):
    """3x3 window reduction (pad=1) at full resolution on a flat (B,C,HW) value."""
    if mode == "max":
        pad = jnp.float32(-jnp.inf)
        red = jnp.maximum
    else:
        pad = jnp.float32(0.0)
        red = lambda a, b: a + b

    def tap(x, delta, m):
        # result[p] = x[p + delta]  (pltpu.roll matches jnp.roll semantics)
        r = pltpu.roll(x, shift=(-delta) % HW, axis=2)
        return jnp.where(m.reshape(1, 1, HW) > 0.5, r, pad)

    mwl = masks_ref[0]
    mwr = masks_ref[1]
    mhu = masks_ref[2]
    mhd = masks_ref[3]
    wred = red(red(tap(v, -1, mwl), v), tap(v, 1, mwr))          # along W (lanes)
    return red(red(tap(wred, -W, mhu), wred), tap(wred, W, mhd))  # along H


def _pool_finish(red_v, sel_ref, inv_ref, mode, Bn, HW, Q):
    """Strided compaction via constant selection matmul + avg divisor."""
    if sel_ref is not None:
        selb = jnp.broadcast_to(sel_ref[...], (Bn, HW, Q))
        out = jnp.einsum("bch,bhq->bcq", red_v, selb,
                         preferred_element_type=jnp.float32)
    else:
        out = red_v
    if mode == "avg":
        out = out * inv_ref[...].reshape(1, 1, Q)
    return out


# ----------------------------------------------------------------------------
# Kernel 1: standalone 3x3 pool (C_in == C_out path).
# ----------------------------------------------------------------------------
def _pool_only_kernel(*refs, mode, stride, W, HW, Q, Bn):
    x_ref, masks_ref = refs[0], refs[1]
    i = 2
    inv_ref = sel_ref = None
    if mode == "avg":
        inv_ref = refs[i]; i += 1
    if stride != 1:
        sel_ref = refs[i]; i += 1
    out_ref = refs[i]

    red_v = _pool_window_flat(x_ref[...], masks_ref, mode, W, HW)
    out = _pool_finish(red_v, sel_ref, inv_ref, mode, Bn, HW, Q)
    out_ref[...] = out.astype(out_ref.dtype)


def pool2d_pallas(x, stride, mode):
    assert mode in ("avg", "max")
    N, C, H, W = x.shape
    HW = H * W
    masks, sel, inv, H_out, W_out, Q = _pool_consts(H, W, stride, mode)
    xr = x.reshape(N, C, HW)                      # free reshape, lane-dense

    per_sample = 2 * (_padded_bytes((C, HW)) + _padded_bytes((C, Q)))
    Bn = _pick_batch_block(N, per_sample)

    in_specs = [pl.BlockSpec((Bn, C, HW), lambda i: (i, 0, 0)),
                pl.BlockSpec((4, HW), lambda i: (0, 0))]
    args = [xr, jnp.asarray(masks)]
    if mode == "avg":
        in_specs.append(pl.BlockSpec((1, Q), lambda i: (0, 0)))
        args.append(jnp.asarray(inv))
    if stride != 1:
        in_specs.append(pl.BlockSpec((HW, Q), lambda i: (0, 0)))
        args.append(jnp.asarray(sel))

    kernel = functools.partial(_pool_only_kernel, mode=mode, stride=stride,
                               W=W, HW=HW, Q=Q, Bn=Bn)
    out = pl.pallas_call(
        kernel,
        out_shape=jax.ShapeDtypeStruct((N, C, Q), jnp.float32),
        grid=(N // Bn,),
        in_specs=in_specs,
        out_specs=pl.BlockSpec((Bn, C, Q), lambda i: (i, 0, 0)),
        compiler_params=_COMPILER_PARAMS,
    )(*args)
    return out.reshape(N, C, H_out, W_out)


# ----------------------------------------------------------------------------
# Kernel 2: batch statistics of the (unmaterialized) 1x1-conv output, via the
#           Gram matrix of relu(x).  mean = w @ R / M;  E[y^2] = w G w^T / M.
# ----------------------------------------------------------------------------
def _stats_kernel(x_ref, g_ref, r_ref):
    xr = jnp.maximum(x_ref[...], 0.0)                               # (Bs, C_in, HW)
    g = jnp.einsum("bch,bdh->bcd", xr, xr,
                   preferred_element_type=jnp.float32)               # (Bs, C_in, C_in)
    g_ref[...] = jnp.sum(g, axis=0, keepdims=True)                   # (1, C_in, C_in)
    r_ref[...] = jnp.sum(xr, axis=(0, 2)).reshape(1, 1, -1)          # (1, 1, C_in)


# ----------------------------------------------------------------------------
# Kernel 3: fused ReLU -> 1x1 conv -> BN affine -> 3x3 pool (no y round trip).
# ----------------------------------------------------------------------------
def _fwd_kernel(*refs, mode, stride, W, HW, Q, Bc, C_out, C_in):
    x_ref, w_ref, scale_ref, shift_ref, masks_ref = refs[:5]
    i = 5
    inv_ref = sel_ref = None
    if mode == "avg":
        inv_ref = refs[i]; i += 1
    if stride != 1:
        sel_ref = refs[i]; i += 1
    out_ref = refs[i]

    xr = jnp.maximum(x_ref[...], 0.0)                               # ReLU (f32)
    wb = jnp.broadcast_to(w_ref[...], (Bc, C_out, C_in))
    y = jnp.einsum("boc,bch->boh", wb, xr,
                   preferred_element_type=jnp.float32)               # (Bc, C_out, HW)
    ya = (y * scale_ref[...].reshape(1, C_out, 1)
          + shift_ref[...].reshape(1, C_out, 1))                     # fused BN affine
    red_v = _pool_window_flat(ya, masks_ref, mode, W, HW)
    out = _pool_finish(red_v, sel_ref, inv_ref, mode, Bc, HW, Q)
    out_ref[...] = out.astype(out_ref.dtype)


def relu_conv_bn_pool_pallas(x, w, gamma, beta, stride, mode, eps=1e-5):
    N, C_in, H, W = x.shape
    C_out = w.shape[0]
    HW = H * W
    masks, sel, inv, H_out, W_out, Q = _pool_consts(H, W, stride, mode)
    xr = x.reshape(N, C_in, HW)                    # free reshape, lane-dense

    # ---- pass 1: partial Gram / row-sum statistics of relu(x) ------------------
    Bs = _pick_batch_block(N, 2 * _padded_bytes((C_in, HW)))
    NB = N // Bs
    g_parts, r_parts = pl.pallas_call(
        _stats_kernel,
        out_shape=(jax.ShapeDtypeStruct((NB, C_in, C_in), jnp.float32),
                   jax.ShapeDtypeStruct((NB, 1, C_in), jnp.float32)),
        grid=(NB,),
        in_specs=[pl.BlockSpec((Bs, C_in, HW), lambda i: (i, 0, 0))],
        out_specs=(pl.BlockSpec((1, C_in, C_in), lambda i: (i, 0, 0)),
                   pl.BlockSpec((1, 1, C_in), lambda i: (i, 0, 0))),
        compiler_params=_COMPILER_PARAMS,
    )(xr)

    # Tiny per-channel finish (C_in x C_in / C_out scalars) outside the kernels.
    M = float(N * HW)
    G = jnp.sum(g_parts, axis=0)                   # (C_in, C_in)
    R = jnp.sum(r_parts, axis=(0, 1))              # (C_in,)
    mean = (w @ R) / M                             # (C_out,)
    ey2 = jnp.einsum("oc,cd,od->o", w, G, w) / M
    var = jnp.maximum(ey2 - mean * mean, 0.0)      # clamp E[y^2]-E[y]^2 cancellation
    scale1 = gamma * lax.rsqrt(var + eps)
    shift1 = beta - mean * scale1
    scale = scale1.reshape(C_out, 1)
    shift = shift1.reshape(C_out, 1)

    # ---- pass 2: fused ReLU -> conv -> affine -> pool ---------------------------
    per_sample = 2 * (_padded_bytes((C_in, HW)) + _padded_bytes((C_out, HW))
                      + _padded_bytes((C_out, Q)))
    Bc = _pick_batch_block(N, per_sample)

    in_specs = [pl.BlockSpec((Bc, C_in, HW), lambda i: (i, 0, 0)),
                pl.BlockSpec((C_out, C_in), lambda i: (0, 0)),
                pl.BlockSpec((C_out, 1), lambda i: (0, 0)),
                pl.BlockSpec((C_out, 1), lambda i: (0, 0)),
                pl.BlockSpec((4, HW), lambda i: (0, 0))]
    args = [xr, w, scale, shift, jnp.asarray(masks)]
    if mode == "avg":
        in_specs.append(pl.BlockSpec((1, Q), lambda i: (0, 0)))
        args.append(jnp.asarray(inv))
    if stride != 1:
        in_specs.append(pl.BlockSpec((HW, Q), lambda i: (0, 0)))
        args.append(jnp.asarray(sel))

    kernel = functools.partial(_fwd_kernel, mode=mode, stride=stride, W=W, HW=HW,
                               Q=Q, Bc=Bc, C_out=C_out, C_in=C_in)
    out = pl.pallas_call(
        kernel,
        out_shape=jax.ShapeDtypeStruct((N, C_out, Q), jnp.float32),
        grid=(N // Bc,),
        in_specs=in_specs,
        out_specs=pl.BlockSpec((Bc, C_out, Q), lambda i: (i, 0, 0)),
        compiler_params=_COMPILER_PARAMS,
    )(*args)
    return out.reshape(N, C_out, H_out, W_out)


# ----------------------------------------------------------------------------
# POOLING module equivalent
# ----------------------------------------------------------------------------
class PoolingPallas:
    def __init__(self, C_in, C_out, stride, mode, key):
        self.stride = stride
        self.mode = mode
        if C_in == C_out:
            self.params = None
        else:
            k1, k2, k3 = jax.random.split(key, 3)
            w = 0.1 * jax.random.normal(k1, (C_out, C_in), jnp.float32)       # 1x1 conv
            gamma = 1.0 + 0.1 * jax.random.normal(k2, (C_out,), jnp.float32)  # BN weight
            beta = 0.1 * jax.random.normal(k3, (C_out,), jnp.float32)         # BN bias
            self.params = (w, gamma, beta)

    def __call__(self, x):
        if self.params is None:
            return pool2d_pallas(x, self.stride, self.mode)
        w, gamma, beta = self.params
        return relu_conv_bn_pool_pallas(x, w, gamma, beta, self.stride, self.mode)


# ----------------------------------------------------------------------------
# Pure-JAX reference (for verification only)
# ----------------------------------------------------------------------------
def _ref_relu_conv_bn(x, w, gamma, beta, eps=1e-5):
    y = jnp.einsum("nchw,oc->nohw", jnp.maximum(x, 0.0), w)
    mean = jnp.mean(y, axis=(0, 2, 3), keepdims=True)
    var = jnp.mean((y - mean) ** 2, axis=(0, 2, 3), keepdims=True)
    yhat = (y - mean) / jnp.sqrt(var + eps)
    return yhat * gamma.reshape(1, -1, 1, 1) + beta.reshape(1, -1, 1, 1)


def _ref_pool(x, stride, mode):
    dims = (1, 1, 3, 3)
    strides = (1, 1, stride, stride)
    pads = ((0, 0), (0, 0), (1, 1), (1, 1))
    if mode == "max":
        return lax.reduce_window(x, -jnp.inf, lax.max, dims, strides, pads)
    s = lax.reduce_window(x, 0.0, lax.add, dims, strides, pads)
    c = lax.reduce_window(jnp.ones_like(x), 0.0, lax.add, dims, strides, pads)
    return s / c


def _ref_pooling_module(x, module, stride, mode):
    if module.params is not None:
        w, gamma, beta = module.params
        x = _ref_relu_conv_bn(x, w, gamma, beta)
    return _ref_pool(x, stride, mode)


if __name__ == "__main__":
    key = jax.random.PRNGKey(0)
    kx, kp1 = jax.random.split(key)
    x = jax.random.normal(kx, (2, 4, 16, 16), jnp.float32)

    # Case 1: C_in != C_out -> ReLUConvBN preprocess, then avg-pool, stride 1.
    mod_avg = PoolingPallas(C_in=4, C_out=8, stride=1, mode="avg", key=kp1)
    out_avg = jax.block_until_ready(mod_avg(x))
    ref_avg = _ref_pooling_module(x, mod_avg, stride=1, mode="avg")
    np.testing.assert_allclose(np.asarray(out_avg), np.asarray(ref_avg),
                               rtol=1e-3, atol=1e-3)

    # Case 2: C_in == C_out -> no preprocess, max-pool, stride 2.
    mod_max = PoolingPallas(C_in=4, C_out=4, stride=2, mode="max", key=kp1)
    out_max = jax.block_until_ready(mod_max(x))
    ref_max = _ref_pooling_module(x, mod_max, stride=2, mode="max")
    np.testing.assert_allclose(np.asarray(out_max), np.asarray(ref_max),
                               rtol=1e-3, atol=1e-3)

    # Case 3: preprocess + avg-pool with stride 2 (exercises the selection-matmul
    # compaction + count_include_pad=False border reciprocals).
    mod_avg2 = PoolingPallas(C_in=4, C_out=8, stride=2, mode="avg", key=kp1)
    out_avg2 = jax.block_until_ready(mod_avg2(x))
    ref_avg2 = _ref_pooling_module(x, mod_avg2, stride=2, mode="avg")
    np.testing.assert_allclose(np.asarray(out_avg2), np.asarray(ref_avg2),
                               rtol=1e-3, atol=1e-3)

    assert out_avg.shape == (2, 8, 16, 16)
    assert out_max.shape == (2, 4, 8, 8)
    assert out_avg2.shape == (2, 8, 8, 8)
    print("KERNEL_OK")
</pallas_src>

<mosaic_0001>
module attributes {stable_mosaic.version = 11 : i64} {
  func.func @_stats_kernel(%arg0: i32, %arg1: memref<1x4x256xf32, #tpu.memory_space<vmem>>, %arg2: memref<1x4x4xf32, #tpu.memory_space<vmem>>, %arg3: memref<1x1x4xf32, #tpu.memory_space<vmem>>) attributes {dimension_semantics = [#tpu.dimension_semantics<parallel>], iteration_bounds = array<i64: 2>, scalar_prefetch = 0 : i64, scratch_operands = 0 : i64, tpu.core_type = #tpu.core_type<tc>, window_params = [{transform_indices = @transform_0, window_bounds = array<i64: 1, 4, 256>}, {transform_indices = @transform_1, window_bounds = array<i64: 1, 4, 4>}, {transform_indices = @transform_2, window_bounds = array<i64: 1, 1, 4>}]} {
    %c0 = arith.constant 0 : index
    %c0_0 = arith.constant 0 : index
    %c0_1 = arith.constant 0 : index
    %0 = vector.load %arg1[%c0, %c0_0, %c0_1] : memref<1x4x256xf32, #tpu.memory_space<vmem>>, vector<1x4x256xf32>
    %cst = arith.constant 0.000000e+00 : f32
    %1 = vector.broadcast %cst : f32 to vector<1x4x256xf32>
    %2 = arith.maximumf %0, %1 : vector<1x4x256xf32>
    "tpu.trace_start"() <{level = 10 : i32, message = "bch,bdh->bcd"}> : () -> ()
    %cst_2 = arith.constant dense<0.000000e+00> : vector<1x4x4xf32>
    %3 = tpu.matmul %2, %2, %cst_2 {dimension_numbers = #tpu.dot_dimension_numbers<[2], [2], [1], [1], [0, 0, 0, 1, 1, 1], [0], [0]>} : vector<1x4x256xf32>, vector<1x4x256xf32>, vector<1x4x4xf32> -> vector<1x4x4xf32>
    "tpu.trace_stop"() : () -> ()
    %cst_3 = arith.constant dense<0.000000e+00> : vector<4x4xf32>
    %4 = vector.multi_reduction <add>, %3, %cst_3 [0] : vector<1x4x4xf32> to vector<4x4xf32>
    %5 = vector.shape_cast %4 : vector<4x4xf32> to vector<1x4x4xf32>
    %c0_4 = arith.constant 0 : index
    %c0_5 = arith.constant 0 : index
    %c0_6 = arith.constant 0 : index
    %6 = vector.load %arg2[%c0_4, %c0_5, %c0_6] : memref<1x4x4xf32, #tpu.memory_space<vmem>>, vector<1x4x4xf32>
    tpu.vector_store %arg2[%c0_4, %c0_5, %c0_6], %5 {strides = array<i32>} : memref<1x4x4xf32, #tpu.memory_space<vmem>>, vector<1x4x4xf32>,
    %cst_7 = arith.constant dense<0.000000e+00> : vector<4xf32>
    %7 = vector.multi_reduction <add>, %2, %cst_7 [0, 2] : vector<1x4x256xf32> to vector<4xf32>
    %8 = vector.shape_cast %7 : vector<4xf32> to vector<1x1x4xf32>
    %c0_8 = arith.constant 0 : index
    %c0_9 = arith.constant 0 : index
    %c0_10 = arith.constant 0 : index
    %9 = vector.load %arg3[%c0_8, %c0_9, %c0_10] : memref<1x1x4xf32, #tpu.memory_space<vmem>>, vector<1x1x4xf32>
    tpu.vector_store %arg3[%c0_8, %c0_9, %c0_10], %8 {strides = array<i32>} : memref<1x1x4xf32, #tpu.memory_space<vmem>>, vector<1x1x4xf32>,
    return
  }
  func.func @transform_0(%arg0: i32) -> (i32, i32, i32) {
    %c0_i32 = arith.constant 0 : i32
    %c0_i32_0 = arith.constant 0 : i32
    %c0_i32_1 = arith.constant 0 : i32
    return %arg0, %c0_i32, %c0_i32_0 : i32, i32, i32
  }
  func.func @transform_1(%arg0: i32) -> (i32, i32, i32) {
    %c0_i32 = arith.constant 0 : i32
    %c0_i32_0 = arith.constant 0 : i32
    %c0_i32_1 = arith.constant 0 : i32
    return %arg0, %c0_i32, %c0_i32_0 : i32, i32, i32
  }
  func.func @transform_2(%arg0: i32) -> (i32, i32, i32) {
    %c0_i32 = arith.constant 0 : i32
    %c0_i32_0 = arith.constant 0 : i32
    %c0_i32_1 = arith.constant 0 : i32
    return %arg0, %c0_i32, %c0_i32_0 : i32, i32, i32
  }
}

</mosaic_0001>

<bundles_post_ra>
// kernel: tpu_custom_call.1
= control target key start
LH: loop header
LB: loop body
LE: loop exit
PB: predicated region body
PF: predicated region fallthrough
CT: control target
= control target key end

     0   :  { %8 = vsyncpa [#allocation3], 0  ;;  %s748_s0 = inlined_call_operand.hbm [shape: f32[2,4,256], index: 0, kind: input, shape index: {}]   ;;  %s749_s1 = inlined_call_operand.hbm [shape: f32[2,4,4], index: 1, kind: output, shape index: {0}]   ;;  %s750_s2 = inlined_call_operand.hbm [shape: f32[2,1,4], index: 2, kind: output, shape index: {1}]  }
   0x1   :  { %10 = vsyncpa [#allocation3 + $0x1], 0 }
   0x2   :  { %11 = vsyncpa [#allocation4], 0 }
   0x3   :  { %13 = vsyncpa [#allocation4 + $0x1], 0 }
   0x4   :  { %14 = vsyncpa [#allocation7], 0 }
   0x5   :  { %16 = vsyncpa [#allocation7 + $0x1], 0  ;;  %s586_s9 = smov 0   ;;  %s588_s10 = smov 0  }
   0x6   :  { %s590_s11 = smov 0   ;;  %s592_s12 = smov 0  }
   0x7 LB: > { %s607_s13 = sadd.s32 4294967295, %s569_s12   ;;  %s376_s14 = sadd.s32 4294967294, %s569_s12   ;;  %s569_s12 = sphi %s592_s12, %s760_s12   ;;  %s565_s11 = sphi %s590_s11, %s759_s11   ;;  %s561_s10 = sphi %s588_s10, %s758_s10   ;;  %s557_s9 = sphi %s586_s9, %s757_s9  }
   0x8   : > { %s611_s15 = sadd.s32 1, %s569_s12   ;;  %s29_s16 = sadd.s32 1, %s565_s11 }
   0x9   : > { %s26_s17 = ssub.s32 %s569_s12, %s611_s15  ;;  %p36_p0 = scmp.ne.s32.totalorder %s565_s11, %s561_s10 }
   0xa   : > { %p27_p1 = scmp.eq.s32.totalorder %s26_s17, 0  ;;  %p37_p2 = scmp.eq.s32.totalorder %s569_s12, 0 }
   0xb   : > { %p42_p3 = scmp.ne.s32.totalorder %s561_s10, %s557_s9  ;;  %p43_p4 = scmp.eq.s32.totalorder %s607_s13, 0 }
   0xc   : > { %s623_s18 = scalar_select %p27_p1, %s565_s11, %s29_s16  }
   0xd   : > { %p625_p5 = por %p37_p2, %p36_p0  ;;  %p629_p6 = por %p43_p4, %p42_p3 }
   0xe   : > { %p66_p7 = scmp.eq.s32.totalorder %s607_s13, 1  ;;  %p72_p8 = scmp.eq.s32.totalorder %s376_s14, 1 }
   0xf   : > { %p407_p10 = scmp.lt.s32.totalorder %s569_s12, 2  ;;  %s118_s23 = sand.u32 1, %s565_s11  }
  0x10   : > { %p636_p11 = por %p66_p7, %p36_p0  ;;  %p640_p12 = por %p72_p8, %p42_p3 }
  0x11   : > { %s389_s24 = sshll.u32 %s569_s12, 3  ;;  %s379_s25 = sshll.u32 %s118_s23, 3 }
  0x12   : > { %s127_s28 = scalar_lea.hbm %s748_s0, %s389_s24  ;;  %s122_s30 = scalar_lea.vmem [#allocation2], %s379_s25 }
  0x13   : > { %s129_s29 = sshll.u32 %s127_s28, 4  ;;  %s131_s3 = sshll.u32 %s122_s30, 4  ;;  %s130_s29 = int_to_ptr.hbm [resolvable:$true] %s129_s29  ;;  %s132_s3 = int_to_ptr.vmem [resolvable:$true] %s131_s3 }
  0x14   : > { %p651_p13 = pnand %p407_p10, %p625_p5  ;;  %p382_p0 = scmp.ge.s32.totalorder %s569_s12, 1 }
  0x15   : > { %p136_p1 = scmp.lt.s32.totalorder %s569_s12, 3  ;;  %s119_s5 = scalar_lea.sflag [#allocation3], %s118_s23 }
  0x16   : > { %s441_s6 = sshra.s32 %s130_s29, 4  ;;  %p445_p3 = pneg %p651_p13  ;;  %s442_s6 = int_to_ptr.hbm [resolvable:$true] %s441_s6 }
  0x17   : > { %s443_s7 = scalar_lea.hbm %s442_s6, 8  ;;  %s448_s16 = scalar_lea.hbm %s748_s0, 16 }
  0x18   : > { %p444_p2 = scmp.ne.s32.totalorder %s442_s6, %s443_s7  ;;  %p449_p5 = scmp.lt.s32.totalorder %s442_s6, %s748_s0 }
  0x19   : > { %p450_p8 = scmp.lt.s32.totalorder %s448_s16, %s443_s7 }
  0x1a   : > { %p446_p4 = pnand %p445_p3, %p444_p2 }
  0x1b   : > { %p451_p10 = por %p450_p8, %p449_p5 }
  0x1c   : > { %p447_p7 = pneg %p446_p4 }
  0x1e   : > { %p452_p9 = pnand %p451_p10, %p447_p7 }
  0x20   : > { %455 = shalt.err (!%p452_p9)
}
  0x21   : > { %399 = dma.hbm_to_vmem [thread:$0]  (!%p651_p13), %s130_s29, 128, %s132_s3, %s119_s5  }
  0x22   : > { %p137_p2 = pnand %p382_p0, %p136_p1 }
  0x23   : > { %s672_s23 = sand.u32 (!%p137_p2), 1, %s561_s10  }
  0x24   : > { %140 = sbr.rel (%p137_p2) target bundleno = 205 (0xcd), region = 24  ;;  %s383_s24 = sshll.u32 (!%p137_p2), %s672_s23, 3 }
  0x25   : > { %s143_s25 = scalar_lea.sflag (!%p137_p2), [#allocation3], %s672_s23  ;;  %s146_s26 = scalar_lea.vmem (!%p137_p2), [#allocation2], %s383_s24 }
  0x29   : > { %544 = dma.done.wait (%p629_p6), %s143_s25, 128  }
  0x2a   : > { %546 = vsyncadd (%p629_p6), %s143_s25, 4294967168  ;;  %v172_v0 = vld [vmem:[%s146_s26] sm:$0xff]  ;;  %vm232_vm0 = vcmask 1043456   ;;  %v239_v11 = vlaneseq  ;;  %s384_s20 = sshll.u32 %s672_s23, 2  ;;  %s386_s27 = sshll.u32 %s607_s13, 2  ;;  %vm243_vm1 = vcmask 24576  }
  0x2b   : > { %v173_v1 = vmax.f32 %v172_v0, 0.0  ;;  %s273_s30 = scalar_lea.hbm %s750_s2, %s607_s13  ;;  %s260_s5 = scalar_lea.hbm %s749_s1, %s386_s27  ;;  %vm225_vm2 = vcmask 27648  }
  0x2c   : > { %v240_v12 = vand.u32 127, %v239_v11  ;;  %s171_s6 = scalar_lea.vmem [#allocation6], %s672_s23  ;;  %s692_s8 = sshll.u32 %s273_s30, 4  ;;  %s278_s8 = int_to_ptr.hbm [resolvable:$true] %s692_s8 }
  0x2d   : > { %175 = vst [vmem:[#allocation1] ss:$2 sm:$0xff] %v173_v1  ;;  %s690_s7 = sshll.u32 %s171_s6, 4  ;;  %s694_s14 = scalar_lea.vmem [#allocation5], %s384_s20  ;;  %s276_s7 = int_to_ptr.vmem [resolvable:$true] %s690_s7 }
  0x2e   : > { %s262_s16 = sshll.u32 %s694_s14, 4  ;;  %s264_s17 = sshll.u32 %s260_s5, 4  ;;  %s699_s16 = int_to_ptr.vmem [resolvable:$true] %s262_s16  ;;  %s701_s17 = int_to_ptr.hbm [resolvable:$true] %s264_s17 }
  0x2f   : > { %s251_s13 = scalar_lea.sflag [#allocation7], %s672_s23  ;;  %s485_s19 = sshra.s32 %s278_s8, 4  ;;  %s486_s19 = int_to_ptr.hbm [resolvable:$true] %s485_s19 }
  0x30   : > { %s487_s24 = scalar_lea.hbm %s486_s19, 1  ;;  %s491_s20 = scalar_lea.hbm %s750_s2, 2 }
  0x31   : > { %p488_p6 = scmp.ne.s32.totalorder %s486_s19, %s487_s24  ;;  %p492_p0 = scmp.lt.s32.totalorder %s486_s19, %s750_s2 }
  0x32   : > { %p493_p1 = scmp.lt.s32.totalorder %s491_s20, %s487_s24 }
  0x33   : > { %p489_p9 = pnand %p488_p6, %p636_p11 }
  0x34   : > { %v176_v2 = vld.sshfl [vmem:[#allocation1] sm:$0xff pattern:$0x75316420]  ;;  %v177_v3 = vld.sshfl [vmem:[#allocation1 + $0x8] sm:$0xff pattern:$0x75316420]  ;;  %p494_p3 = por %p493_p1, %p492_p0 }
  0x35   : > { %180 = vst [vmem:[#allocation1] ss:$2 sm:$0xff] %v173_v1  ;;  %p490_p13 = pneg %p489_p9 }
  0x37   : > { %p495_p4 = pnand %p494_p3, %p490_p13 }
  0x3c   : > { %v181_v4 = vld.sshfl [vmem:[#allocation1] sm:$0xff pattern:$0x75316420]  ;;  %v182_v5 = vld.sshfl [vmem:[#allocation1 + $0x8] sm:$0xff pattern:$0x75316420] }
  0x3d   : > { %200 = vmatpush.xpose.msra.mxu0 %v181_v4  ;;  %220 = vmatpush.xpose.msra.mxu1 %v182_v5  ;;  %227 = vst [vmem:[#allocation1] ss:$2 sm:$0xff] %v173_v1 }
  0x40   : > { %201 = vmatmul.f32.vlgmr.msra.gmra.mxu0 %v176_v2  ;;  %221 = vmatmul.f32.vlgmr.msra.gmra.mxu1 %v177_v3 }
  0x44   : > { %v228_v6 = vld.sshfl [vmem:[#allocation1] sm:$0xff pattern:$0x75316420]  ;;  %v229_v7 = vld.sshfl [vmem:[#allocation1 + $0x8] sm:$0xff pattern:$0x75316420] }
  0x45   : > { %v233_v8 = vsel %vm232_vm0, %v228_v6, 0.0  ;;  %v234_v9 = vsel %vm232_vm0, %v229_v7, 0.0 }
  0x46   : > { %v235_v10 = vadd.f32 %v234_v9, %v233_v8 }
  0x48   : > { %236 = vadd.xlane.f32.xlu0 %v235_v10 }
  0xbb   : > { %v237_v13 = vpop.xlane.xlu0 %236 }
  0xbc   : > { %v241_v14 = vperm.slane %v237_v13, %v240_v12 }
  0xbd   : > { %v202_v15 = vpop.f32.mrf.mxu0  ;;  %v222_v16 = vpop.f32.mrf.mxu1 }
  0xbe   : > { %v223_v17 = vadd.f32 %v222_v16, %v202_v15  ;;  %244 = vst.msk [vmem:[%s171_s6] sm:$0x1] %vm243_vm1, %v241_v14 }
  0xbf   : > { %498 = shalt.err (!%p495_p4)
}
  0xc0   : > { %393 = dma.vmem_to_hbm [thread:$0]  (%p636_p11), %s276_s7, 16, %s278_s8, %s251_s13   ;;  %226 = vst.msk [vmem:[%s694_s14] sm:$0xf] %vm225_vm2, %v223_v17 }
  0xc1   : > { %s246_s29 = scalar_lea.sflag [#allocation4], %s672_s23  ;;  %s513_s30 = sshra.s32 %s701_s17, 4  ;;  %s514_s30 = int_to_ptr.hbm [resolvable:$true] %s513_s30 }
  0xc2   : > { %s515_s3 = scalar_lea.hbm %s514_s30, 4  ;;  %s519_s6 = scalar_lea.hbm %s749_s1, 8 }
  0xc3   : > { %p516_p7 = scmp.ne.s32.totalorder %s514_s30, %s515_s3  ;;  %p520_p10 = scmp.lt.s32.totalorder %s514_s30, %s749_s1 }
  0xc4   : > { %p521_p2 = scmp.lt.s32.totalorder %s519_s6, %s515_s3 }
  0xc5   : > { %p517_p5 = pnand %p516_p7, %p636_p11 }
  0xc6   : > { %p522_p6 = por %p521_p2, %p520_p10 }
  0xc7   : > { %p518_p8 = pneg %p517_p5 }
  0xc9   : > { %p523_p9 = pnand %p522_p6, %p518_p8 }
  0xcb   : > { %526 = shalt.err (!%p523_p9)
}
  0xcc   : > { %392 = dma.vmem_to_hbm [thread:$0]  (%p636_p11), %s699_s16, 64, %s701_s17, %s246_s29  }
  0xcd PF: > { %s289_s23 = sand.u32 1, %s557_s9   ;;  %p756_p13 = scmp.ge.s32.totalorder %s569_s12, 2 }
  0xce   : > { %s290_s7 = scalar_lea.sflag [#allocation4], %s289_s23 }
  0xcf   : > { %p401_p0 = pnand %p756_p13, %p640_p12 }
  0xd1   : > { %p402_p1 = pneg %p401_p0 }
  0xd3   : > { %548 = dma.done.wait (%p402_p1), %s290_s7, 64  }
  0xd4   : > { %550 = vsyncadd (%p402_p1), %s290_s7, 4294967232  ;;  %s300_s8 = scalar_lea.sflag [#allocation7], %s289_s23 }
  0xd5   : > { %552 = dma.done.wait (%p402_p1), %s300_s8, 16  }
  0xd6   : > { %554 = vsyncadd (%p402_p1), %s300_s8, 4294967280  ;;  %p19_p11 = scmp.ge.s32.totalorder %s611_s15, 4   ;;  %s757_s9 = smov %s561_s10 }
  0xd7   : > { %s758_s10 = smov %s565_s11  ;;  %s759_s11 = smov %s623_s18 }
  0xd8   : > { %s760_s12 = smov %s611_s15  ;;  %21 = sbr.rel (!%p19_p11) target bundleno = 7 (0x7), region = 86 }
  0xdd   :  { %305 = vsyncpa [#allocation3], 1 }
  0xde   :  { %307 = vsyncpa [#allocation3 + $0x1], 1 }
  0xdf   :  { %308 = vsyncpa [#allocation4], 1 }
  0xe0   :  { %310 = vsyncpa [#allocation4 + $0x1], 1 }
  0xe1   :  { %311 = vsyncpa [#allocation7], 1 }
  0xe2   :  { %313 = vsyncpa [#allocation7 + $0x1], 1 }

</bundles_post_ra>
